<compile_context>
chip_gen: v5e
topology: v5e:2x2
jax: 0.10.0
libtpu: 0.0.40
codegen_flags: <defaults>
</compile_context>

<pallas_src>
import functools

import jax
import jax.numpy as jnp
from jax.experimental import pallas as pl
from jax.experimental.pallas import tpu as pltpu

_NEG_SLOPE = 0.01  # PyTorch F.leaky_relu default


def _leaky_relu(v):
    return jnp.where(v > 0, v, _NEG_SLOPE * v)


def _mlp_kernel(x_ref, w1_ref, b1_ref, w2_ref, b2_ref, o_ref, *, chunk):
    """fc1 + leaky_relu + fc2 + leaky_relu for one TB-row batch tile.

    The tile is processed in `chunk`-row pieces so the f32 hidden activation
    stays small no matter how large the (DMA-sized) tile is.
    """
    w1 = w1_ref[...]            # (n, Hp)   VMEM-resident across the grid
    b1 = b1_ref[...]            # (1, Hp)
    w2 = w2_ref[...]            # (1, Hp)
    b2 = b2_ref[...]            # (1, 1)
    n_chunks = x_ref.shape[0] // chunk

    def body(c, carry):
        off = pl.multiple_of(c * chunk, chunk)
        xc = x_ref[pl.ds(off, chunk), :]                         # (chunk, n) f32
        h = jnp.dot(xc, w1, preferred_element_type=jnp.float32)  # (chunk, Hp)
        h = _leaky_relu(h + b1)
        # fc2 as an NT matmul: y[0, r] = sum_k w2[0, k] * h[r, k] -> (1, chunk)
        y = jax.lax.dot_general(w2, h, (((1,), (1,)), ((), ())),
                                preferred_element_type=jnp.float32)
        y = _leaky_relu(y + b2)
        o_ref[pl.ds(c, 1), :] = y.astype(o_ref.dtype)            # chunk row c
        return carry

    jax.lax.fori_loop(0, n_chunks, body, None)


def _vmem_limit_bytes():
    """Generation-aware scoped-VMEM limit (explicit: lifts v5e's 16 MiB default)."""
    phys = 64 * 1024 * 1024                      # conservative fallback (v7x per-TC)
    try:
        info = pltpu.get_tpu_info()
        phys = int(getattr(info, "vmem_capacity_bytes", phys))
    except Exception:
        pass
    # v7x (64 MiB/TC) -> 48 MiB;  v5e/v6e (128 MiB) -> 96 MiB.
    return min(phys * 3 // 4, 96 * 1024 * 1024)


def _choose_tiling(B, n, Hp, vmem_budget):
    """Pick (TB, CH): rows per grid step and rows per in-kernel compute chunk."""
    lanes_n = pl.cdiv(n, 128) * 128          # x is lane-padded to this width in VMEM
    row_x = lanes_n * 4                      # f32 bytes per x row in VMEM
    b_ceil = max(8, pl.cdiv(B, 8) * 8)

    if b_ceil <= 512:                        # tiny batch: one tile, one chunk
        return b_ceil, b_ceil

    ch = 512                                 # rows per inner fc1+fc2 chunk (bounds f32 h)
    # Honest VMEM accounting: constant-index weight blocks are still
    # double-buffered (2x); (1, Hp) rows sublane-pad to 8; f32 h chunk included.
    resident = 2 * (lanes_n * Hp + 2 * 8 * Hp + 8 * 128) * 4
    resident += 2 * ch * Hp * 4
    per_row = 2 * row_x + 2 * 8 * 4          # double-buffered x tile + out slab rows
    cap_rows = (vmem_budget - resident) // per_row

    target_rows = (4 * 1024 * 1024) // row_x  # ~4 MiB of x per grid step (amortize ~0.35us/step)
    half_batch = pl.cdiv(b_ceil, 2)           # keep >=2 grid steps (megacore / v7x)

    tb = min(cap_rows, target_rows, half_batch)
    tb = max(128, tb // 128 * 128)            # floor; tiny fallback if weights are huge
    ch = min(ch, tb)
    tb = max(ch, tb // ch * ch)               # ensure ch | tb
    return tb, ch


@jax.jit
def net3_forward(x, w1, b1, w2, b2):
    """x: [B, n] f32; w1: [n, H]; b1: [H]; w2: [H, 1]; b2: [1] -> [B, 1] f32."""
    B, n = x.shape
    H = w1.shape[1]
    Hp = pl.cdiv(H, 128) * 128

    # Zero-pad the hidden dim 100 -> 128 (exact: leaky_relu(0)=0, padded w2 rows are 0).
    w1p = jnp.zeros((n, Hp), jnp.float32).at[:, :H].set(w1.astype(jnp.float32))
    b1p = jnp.zeros((1, Hp), jnp.float32).at[:, :H].set(
        b1.astype(jnp.float32).reshape(1, H))
    w2p = jnp.zeros((1, Hp), jnp.float32).at[:, :H].set(
        w2.astype(jnp.float32).reshape(1, H))
    b2p = b2.astype(jnp.float32).reshape(1, 1)

    vmem_limit = _vmem_limit_bytes()
    TB, CH = _choose_tiling(B, n, Hp, vmem_budget=vmem_limit - (8 << 20))
    num_tiles = pl.cdiv(B, TB)

    cost = pl.CostEstimate(
        flops=2 * B * n * Hp + 2 * B * Hp,
        transcendentals=0,
        bytes_accessed=B * n * 4 + n * Hp * 4 + (2 * Hp + 1) * 4 + B * 4,
    )

    out = pl.pallas_call(
        functools.partial(_mlp_kernel, chunk=CH),
        out_shape=jax.ShapeDtypeStruct((num_tiles, TB // CH, CH), jnp.float32),
        grid=(num_tiles,),
        in_specs=[
            # x streams tile-by-tile straight from HBM as f32 (no wrapper cast/pad).
            # The ragged final tile reads undefined pad rows; they only affect
            # output rows that are sliced off below.
            pl.BlockSpec((TB, n), lambda i: (i, 0)),
            # Constant-index blocks -> DMA'd once, VMEM-resident weights.
            pl.BlockSpec((n, Hp), lambda i: (0, 0)),
            pl.BlockSpec((1, Hp), lambda i: (0, 0)),
            pl.BlockSpec((1, Hp), lambda i: (0, 0)),
            pl.BlockSpec((1, 1), lambda i: (0, 0)),
        ],
        # Lane-dense output slab per tile; leading grid dim squeezed from the kernel ref.
        out_specs=pl.BlockSpec((None, TB // CH, CH), lambda i: (i, 0, 0)),
        compiler_params=pltpu.CompilerParams(
            dimension_semantics=("parallel",),
            vmem_limit_bytes=vmem_limit,
        ),
        cost_estimate=cost,
    )(x, w1p, b1p, w2p, b2p)

    return out.reshape(num_tiles * TB, 1)[:B]


def init_params(key, n, hidden=100, out=1):
    """PyTorch Linear default init: U[-1/sqrt(fan_in), 1/sqrt(fan_in)]."""
    k1, k2, k3, k4 = jax.random.split(key, 4)
    bound1 = 1.0 / jnp.sqrt(jnp.float32(n))
    bound2 = 1.0 / jnp.sqrt(jnp.float32(hidden))
    w1 = jax.random.uniform(k1, (n, hidden), jnp.float32, -bound1, bound1)
    b1 = jax.random.uniform(k2, (hidden,), jnp.float32, -bound1, bound1)
    w2 = jax.random.uniform(k3, (hidden, out), jnp.float32, -bound2, bound2)
    b2 = jax.random.uniform(k4, (out,), jnp.float32, -bound2, bound2)
    return w1, b1, w2, b2


def _reference(x, w1, b1, w2, b2):
    h = x @ w1 + b1
    h = jnp.where(h > 0, h, _NEG_SLOPE * h)
    y = h @ w2 + b2
    return jnp.where(y > 0, y, _NEG_SLOPE * y)


if __name__ == "__main__":
    key = jax.random.PRNGKey(0)
    k_x, k_p = jax.random.split(key)

    # Small shape consistent with Net_3(n): batch=8, n=32.
    B, n = 8, 32
    x = jax.random.normal(k_x, (B, n), jnp.float32)
    params = init_params(k_p, n)
    out = jax.block_until_ready(net3_forward(x, *params))
    assert out.shape == (B, 1)
    assert jnp.allclose(out, _reference(x, *params), atol=1e-2, rtol=1e-2)

    # Larger shapes: exercise multi-tile grid, in-kernel chunk loop, ragged last tile.
    for B2, n2 in ((4096, 32), (1000, 48)):
        k_x2, k_p2 = jax.random.split(jax.random.PRNGKey(B2 + n2))
        x2 = jax.random.normal(k_x2, (B2, n2), jnp.float32)
        p2 = init_params(k_p2, n2)
        o2 = jax.block_until_ready(net3_forward(x2, *p2))
        assert o2.shape == (B2, 1)
        assert jnp.allclose(o2, _reference(x2, *p2), atol=1e-2, rtol=1e-2)

    print("KERNEL_OK")
</pallas_src>

<mosaic_0001>
module attributes {stable_mosaic.version = 11 : i64} {
  func.func @_mlp_kernel(%arg0: i32, %arg1: memref<8x32xf32, #tpu.memory_space<vmem>>, %arg2: memref<32x128xf32, #tpu.memory_space<vmem>>, %arg3: memref<1x128xf32, #tpu.memory_space<vmem>>, %arg4: memref<1x128xf32, #tpu.memory_space<vmem>>, %arg5: memref<1x1xf32, #tpu.memory_space<vmem>>, %arg6: memref<1x1x8xf32, #tpu.memory_space<vmem>>) attributes {dimension_semantics = [#tpu.dimension_semantics<parallel>], iteration_bounds = array<i64: 1>, scalar_prefetch = 0 : i64, scratch_operands = 0 : i64, tpu.core_type = #tpu.core_type<tc>, window_params = [{transform_indices = @transform_0, window_bounds = array<i64: 8, 32>}, {pipeline_mode = #tpu.pipeline_mode<synchronous>, transform_indices = @transform_1, window_bounds = array<i64: 32, 128>}, {pipeline_mode = #tpu.pipeline_mode<synchronous>, transform_indices = @transform_2, window_bounds = array<i64: 1, 128>}, {pipeline_mode = #tpu.pipeline_mode<synchronous>, transform_indices = @transform_3, window_bounds = array<i64: 1, 128>}, {pipeline_mode = #tpu.pipeline_mode<synchronous>, transform_indices = @transform_4, window_bounds = array<i64: 1, 1>}, {transform_indices = @transform_5, window_bounds = array<i64: 1, 1, 8>}]} {
    %c0 = arith.constant 0 : index
    %c0_0 = arith.constant 0 : index
    %0 = vector.load %arg2[%c0, %c0_0] : memref<32x128xf32, #tpu.memory_space<vmem>>, vector<32x128xf32>
    %c0_1 = arith.constant 0 : index
    %c0_2 = arith.constant 0 : index
    %1 = vector.load %arg3[%c0_1, %c0_2] : memref<1x128xf32, #tpu.memory_space<vmem>>, vector<1x128xf32>
    %c0_3 = arith.constant 0 : index
    %c0_4 = arith.constant 0 : index
    %2 = vector.load %arg4[%c0_3, %c0_4] : memref<1x128xf32, #tpu.memory_space<vmem>>, vector<1x128xf32>
    %c0_5 = arith.constant 0 : index
    %c0_6 = arith.constant 0 : index
    %3 = vector.load %arg5[%c0_5, %c0_6] : memref<1x1xf32, #tpu.memory_space<vmem>>, vector<1x1xf32>
    %c0_i32 = arith.constant 0 : i32
    %c8_i32 = arith.constant 8 : i32
    %4 = arith.muli %c0_i32, %c8_i32 : i32
    %5 = tpu.assume_multiple %4, 8 : i32
    %6 = arith.index_cast %5 : i32 to index
    %c0_7 = arith.constant 0 : index
    %7 = vector.load %arg1[%6, %c0_7] : memref<8x32xf32, #tpu.memory_space<vmem>>, vector<8x32xf32>
    %cst = arith.constant dense<0.000000e+00> : vector<8x128xf32>
    %8 = tpu.matmul %7, %0, %cst {dimension_numbers = #tpu.dot_dimension_numbers<[1], [0], [0], [1], [0, 0, 1, 1], [], []>} : vector<8x32xf32>, vector<32x128xf32>, vector<8x128xf32> -> vector<8x128xf32>
    %9 = vector.broadcast %1 : vector<1x128xf32> to vector<8x128xf32>
    %10 = arith.addf %8, %9 : vector<8x128xf32>
    %cst_8 = arith.constant 0.000000e+00 : f32
    %11 = vector.broadcast %cst_8 : f32 to vector<8x128xf32>
    %12 = arith.cmpf ogt, %10, %11 : vector<8x128xf32>
    %cst_9 = arith.constant 0.00999999977 : f32
    %13 = vector.broadcast %cst_9 : f32 to vector<8x128xf32>
    %14 = arith.mulf %13, %10 : vector<8x128xf32>
    %15 = arith.select %12, %10, %14 : vector<8x128xi1>, vector<8x128xf32>
    %cst_10 = arith.constant dense<0.000000e+00> : vector<1x8xf32>
    %16 = tpu.matmul %2, %15, %cst_10 {dimension_numbers = #tpu.dot_dimension_numbers<[1], [1], [0], [0], [0, 0, 1, 0], [], []>} : vector<1x128xf32>, vector<8x128xf32>, vector<1x8xf32> -> vector<1x8xf32>
    %17 = vector.broadcast %3 : vector<1x1xf32> to vector<1x8xf32>
    %18 = arith.addf %16, %17 : vector<1x8xf32>
    %cst_11 = arith.constant 0.000000e+00 : f32
    %19 = vector.broadcast %cst_11 : f32 to vector<1x8xf32>
    %20 = arith.cmpf ogt, %18, %19 : vector<1x8xf32>
    %cst_12 = arith.constant 0.00999999977 : f32
    %21 = vector.broadcast %cst_12 : f32 to vector<1x8xf32>
    %22 = arith.mulf %21, %18 : vector<1x8xf32>
    %23 = arith.select %20, %18, %22 : vector<1x8xi1>, vector<1x8xf32>
    %c0_13 = arith.constant 0 : index
    %24 = arith.index_cast %c0_i32 : i32 to index
    %c0_14 = arith.constant 0 : index
    %25 = vector.load %arg6[%c0_13, %24, %c0_14] : memref<1x1x8xf32, #tpu.memory_space<vmem>>, vector<1x1x8xf32>
    %26 = vector.shape_cast %25 : vector<1x1x8xf32> to vector<1x8xf32>
    %27 = vector.shape_cast %23 : vector<1x8xf32> to vector<1x1x8xf32>
    tpu.vector_store %arg6[%c0_13, %24, %c0_14], %27 {strides = array<i32>} : memref<1x1x8xf32, #tpu.memory_space<vmem>>, vector<1x1x8xf32>,
    %c1_i32 = arith.constant 1 : i32
    return
  }
  func.func @transform_0(%arg0: i32) -> (i32, i32) {
    %c0_i32 = arith.constant 0 : i32
    %c0_i32_0 = arith.constant 0 : i32
    return %arg0, %c0_i32 : i32, i32
  }
  func.func @transform_1(%arg0: i32) -> (i32, i32) {
    %c0_i32 = arith.constant 0 : i32
    %c0_i32_0 = arith.constant 0 : i32
    %c0_i32_1 = arith.constant 0 : i32
    return %c0_i32, %c0_i32_0 : i32, i32
  }
  func.func @transform_2(%arg0: i32) -> (i32, i32) {
    %c0_i32 = arith.constant 0 : i32
    %c0_i32_0 = arith.constant 0 : i32
    %c0_i32_1 = arith.constant 0 : i32
    return %c0_i32, %c0_i32_0 : i32, i32
  }
  func.func @transform_3(%arg0: i32) -> (i32, i32) {
    %c0_i32 = arith.constant 0 : i32
    %c0_i32_0 = arith.constant 0 : i32
    %c0_i32_1 = arith.constant 0 : i32
    return %c0_i32, %c0_i32_0 : i32, i32
  }
  func.func @transform_4(%arg0: i32) -> (i32, i32) {
    %c0_i32 = arith.constant 0 : i32
    %c0_i32_0 = arith.constant 0 : i32
    %c0_i32_1 = arith.constant 0 : i32
    return %c0_i32, %c0_i32_0 : i32, i32
  }
  func.func @transform_5(%arg0: i32) -> (i32, i32, i32) {
    %c0_i32 = arith.constant 0 : i32
    %c0_i32_0 = arith.constant 0 : i32
    %c0_i32_1 = arith.constant 0 : i32
    return %arg0, %c0_i32, %c0_i32_0 : i32, i32, i32
  }
}

</mosaic_0001>

<bundles_post_ra>
// kernel: net3_forward.1
= control target key start
LH: loop header
LB: loop body
LE: loop exit
PB: predicated region body
PF: predicated region fallthrough
CT: control target
= control target key end

     0   :  { %s198_s0 = inlined_call_operand.vmem [shape: f32[8,32], index: 0, kind: input, shape index: {}]   ;;  %s199_s1 = inlined_call_operand.vmem [shape: f32[32,128], index: 1, kind: input, shape index: {}]   ;;  %s200_s2 = inlined_call_operand.vmem [shape: f32[1,128], index: 2, kind: input, shape index: {}]   ;;  %s201_s3 = inlined_call_operand.vmem [shape: f32[1,128], index: 3, kind: input, shape index: {}]   ;;  %s202_s4 = inlined_call_operand.<no memory space> [shape: f32[1,1], index: 4, kind: input, shape index: {}]   ;;  %s203_s5 = inlined_call_operand.hbm [shape: f32[1,1,8], index: 5, kind: output, shape index: {}]  }
   0x1   :  { %v10_v0 = vstv %s202_s4 }
   0x2   :  { %11 = vst [vmem:[#allocation2] sm:$0x1] %v10_v0 }
   0x3   :  { %v26_v1 = vld [vmem:[%s199_s1 + $0x18] sm:$0xff]  ;;  %v25_v2 = vld [vmem:[%s199_s1 + $0x10] sm:$0xff]  ;;  %v24_v3 = vld [vmem:[%s199_s1 + $0x8] sm:$0xff] }
   0x4   :  { %50 = vmatpush.msra.mxu0 %v26_v1 }
   0x5   :  { %12 = vsyncpa [#allocation4], 0  ;;  %v23_v4 = vld [vmem:[%s199_s1] sm:$0xff]  ;;  %vm34_vm0 = vcmask 261120   ;;  %v139_v7 = vmov 0   ;;  %vm90_vm3 = vcmask 57344  }
   0x6   :  { %51 = vmatpush.msra.mxu0 %v25_v2  ;;  %v30_v5 = vld [vmem:[%s198_s0] sm:$0xff]  ;;  %111 = vset.pattern.permute.xlu0 %v139_v7  ;;  %s140_s0 = smov [#allocation3]  }
   0x7   :  { %v112_v8 = vld [vmem:[%s200_s2] ss:$0 sm:$0xff]  ;;  %s97_s7 = sshll.u32 %s140_s0, 4  ;;  %s99_s2 = sshll.u32 %s203_s5, 4  ;;  %s98_s7 = int_to_ptr.vmem [resolvable:$true] %s97_s7  ;;  %s100_s2 = int_to_ptr.hbm [resolvable:$true] %s99_s2 }
   0x8   :  { %52 = vmatpush.msra.mxu0 %v24_v3  ;;  %v28_v13 = vld [vmem:[%s201_s3] sm:$0x1] }
   0x9   :  { %v29_v6 = vld [vmem:[#allocation2] sm:$0x1] }
   0xa   :  { %53 = vmatpush.msra.mxu0 %v23_v4  ;;  %63 = vperm.xlu0 %111, %v29_v6  }
   0xb   :  { %108 = vmatmul.msk.f32.vlgmr.msra.gmra.mxu0 %vm34_vm0, %v30_v5 }
  0x7c   :  { %v64_v14 = vpop.permute.xlu0 %63 }
  0x7d   :  { %v66_v15 = vperm.slane %v64_v14, 0 }
  0x88   :  { %v55_v9 = vpop.f32.mrf.mxu0 }
  0x89   :  { %v56_v10 = vadd.f32 %v112_v8, %v55_v9 }
  0x8b   :  { %vm58_vm1 = vcmp.gt.f32.partialorder %v56_v10, 0.0  ;;  %v59_v11 = vmul.f32 0.01, %v56_v10 }
  0x8d   :  { %v60_v12 = vsel %vm58_vm1, %v56_v10, %v59_v11 }
  0x8e   :  { %82 = vmatpush.xpose.msra.mxu1 %v60_v12 }
  0x91   :  { %83 = vmatmul.f32.vlgmr.msra.gmra.mxu1 %v28_v13 }
 0x10e   :  { %v84_v16 = vpop.f32.mrf.mxu1 }
 0x10f   :  { %v85_v17 = vadd.f32 %v84_v16, %v66_v15 }
 0x111   :  { %vm87_vm2 = vcmp.gt.f32.partialorder %v85_v17, 0.0  ;;  %v88_v18 = vmul.f32 0.01, %v85_v17 }
 0x113   :  { %v89_v19 = vsel %vm87_vm2, %v85_v17, %v88_v18 }
 0x114   :  { %91 = vst.msk [vmem:[#allocation3] sm:$0x1] %vm90_vm3, %v89_v19 }
 0x115   :  { %102 = dma.vmem_to_hbm [thread:$0]  %s98_s7, 16, %s100_s2, [#allocation4]  }
 0x116   :  { %137 = dma.done.wait [#allocation4], 16  }
 0x117   :  { %138 = vsyncadd [#allocation4], 4294967280 }
 0x118   :  { %107 = vsyncpa [#allocation4], 1 }

</bundles_post_ra>
